<compile_context>
chip_gen: v6e
topology: v6e:2x2x1
jax: 0.10.0
libtpu: 0.0.40
codegen_flags: <defaults>
</compile_context>

<pallas_src>
import functools

import jax
import jax.numpy as jnp
from jax.experimental import pallas as pl
from jax.experimental.pallas import tpu as pltpu


def _round_up(x, m):
    return (x + m - 1) // m * m


def _device_kind():
    try:
        return jax.devices()[0].device_kind.lower()
    except Exception:
        return ""


def _edge_compute_dtype():
    # bf16 elementwise edge math only on generations with bf16-native VALU/EUP (v6e/v7x);
    # v5e (and anything unrecognized) stays f32.
    kind = _device_kind()
    if any(tag in kind for tag in ("v6", "v7", "7x")):
        return jnp.bfloat16
    return jnp.float32


def _plan_tiles(n, tile_m=None, tile_k=None):
    # Generation-aware tiles (multiples of 128, so the int8 adjacency min tile (32,128)
    # and lane-density always hold). 256 fills the MXU M dim and halves grid-step
    # overhead on v5e/v6e; 128 dst tiles on v7x keep both TensorCores fed at moderate N.
    kind = _device_kind()
    if tile_k is None:
        tile_k = 128 if n <= 128 else 256
    if tile_m is None:
        tile_m = 128 if (n <= 128 or "v7" in kind or "7x" in kind) else 256
    n_pad = _round_up(n, max(tile_m, tile_k, 128))
    return tile_m, tile_k, n_pad


def prepare_adjacency(adj, n_pad):
    """Pad adj[dst, src] to (n_pad, n_pad) and cast to int8 {0,1}.

    Hoisted out of the per-call hot path: for a fixed graph call this once and pass the
    result to gat_conv. Doing it per forward call reads f32 N^2 and writes N^2 -- roughly
    3x the adjacency bytes the attention kernel itself streams.
    """
    n = adj.shape[0]
    out = jnp.zeros((n_pad, n_pad), jnp.int8)
    return out.at[:n, :n].set((adj > 0).astype(jnp.int8))


def _elu(x):
    # ELU with alpha=1 (torch.nn.ELU default); min() keeps exp() from overflowing in the
    # not-taken branch. Dtype-preserving (weak-typed literals).
    return jnp.where(x > 0, x, jnp.exp(jnp.minimum(x, 0.0)) - 1.0)


# ---------------- kernel 1: node projection (row-tiled, "parallel" grid) ----------------

def _project_kernel(f_out, x_ref, w_ref, b_ref, ws_ref, y_ref, s_ref, d_ref):
    # x_ref : (TR, F_in)  bf16   node-feature row tile (zero-padded rows)
    # w_ref : (F_in, Fp)  bf16   theta weight; col f_out = W @ w_dst; pad cols = 0
    # b_ref : (1, Fp)     f32    theta bias;   col f_out = b @ w_dst; pad cols = 0
    # ws_ref: (1, Fp)     f32    atten_src vector (0 in col f_out and pad cols)
    # outputs: y (TR, Fp) bf16,  s (1, TR) f32,  d (TR, 1) f32
    y_aug = jnp.dot(x_ref[...], w_ref[...],
                    preferred_element_type=jnp.float32) + b_ref[...]        # (TR, Fp) f32
    # s[0, v] = Y[v] . w_src  -- contracted as (1,Fp) x (TR,Fp)^T, no transposes
    s_ref[...] = jax.lax.dot_general(
        ws_ref[...], y_aug, (((1,), (1,)), ((), ())),
        preferred_element_type=jnp.float32)                                 # (1, TR)
    d_ref[...] = y_aug[:, f_out:f_out + 1]                                  # folded atten_dst
    y_ref[...] = y_aug.astype(jnp.bfloat16)                                 # MXU operand later


# ------ kernel 2: online-softmax masked attention + aggregation (dst x src grid) ------

def _attend_kernel(edge_dtype, s_ref, d_ref, y_ref, adj_ref, out_ref,
                   m_ref, l_ref, acc_ref):
    # s_ref  : (1, TK)    f32   per-source logit for this src tile
    # d_ref  : (TM, 1)    f32   per-destination logit for this dst tile
    # y_ref  : (TK, Fp)   bf16  projected node features for this src tile
    # adj_ref: (TM, TK)   int8  adjacency block, adj[dst, src] in {0, 1}
    # out_ref: (TM, Fp)   f32
    # scratch: m (TM,1) f32 running max, l (TM,1) f32 running sum, acc (TM,Fp) f32
    k = pl.program_id(1)

    @pl.when(k == 0)
    def _():
        m_ref[...] = jnp.full_like(m_ref, -1e30)
        l_ref[...] = jnp.zeros_like(l_ref)
        acc_ref[...] = jnp.zeros_like(acc_ref)

    cdt = edge_dtype
    neg_big = jnp.asarray(-1e30, dtype=cdt)
    zero = jnp.asarray(0.0, dtype=cdt)

    mask = adj_ref[...] > 0                                             # int8 -> bool
    scores = d_ref[...].astype(cdt) + s_ref[...].astype(cdt)            # (TM, TK)
    logits = jnp.where(mask, _elu(scores), neg_big)                     # self.act on edges
    m_tile = jnp.max(logits, axis=-1, keepdims=True).astype(jnp.float32)
    m_new = jnp.maximum(m_ref[...], m_tile)                             # (TM, 1) f32
    # Unnormalized weights. The explicit zeroing of non-edges is load-bearing: for rows
    # whose running max is still -1e30 (isolated / padded destinations) exp(logits - m)
    # would otherwise be exp(0) = 1.
    p = jnp.where(mask, jnp.exp(logits - m_new.astype(cdt)), zero)      # (TM, TK) cdt
    row_sum = jnp.sum(p.astype(jnp.float32), axis=-1, keepdims=True)    # f32 reduction
    scale = jnp.exp(m_ref[...] - m_new)                                 # f32 rescale factor
    l_ref[...] = scale * l_ref[...] + row_sum
    # deferred softmax normalization: aggregate with unnormalized p (bf16 MXU operands,
    # f32 accumulation); alpha is never materialized and there is no O(N^2) divide.
    acc_ref[...] = scale * acc_ref[...] + jnp.dot(
        p.astype(jnp.bfloat16), y_ref[...], preferred_element_type=jnp.float32)
    m_ref[...] = m_new

    @pl.when(k == pl.num_programs(1) - 1)
    def _():
        inv = pl.reciprocal(jnp.maximum(l_ref[...], 1e-30), approx=True)   # EUP slot
        out_ref[...] = _elu(acc_ref[...] * inv)          # isolated dst: acc=0 -> ELU(0)=0


def gat_conv(x, w, b, wsrc, wdst, adj, *, tile_m=None, tile_k=None):
    """GATConv forward.

    x:(N,F_in) w:(F_in,F_out) b:(1,F_out) wsrc:(1,F_out) wdst:(F_out,1)
    adj: either the raw (N,N) matrix with adj[dst,src]!=0 iff directed edge src->dst, or
    the pre-padded int8 (n_pad,n_pad) matrix from prepare_adjacency (preferred).
    Returns (N, F_out) f32.
    """
    N, f_in = x.shape
    f_out = w.shape[1]
    tile_m, tile_k, n_pad = _plan_tiles(N, tile_m, tile_k)
    tile_r = max(tile_m, tile_k)                 # projection row tile (divides n_pad)
    # lane-dense feature width: F_out columns of Y + 1 folded atten_dst column, pad to 128
    f_pad = _round_up(f_out + 1, 128)
    edge_dtype = _edge_compute_dtype()

    # ---- wrapper-side layout prep (fold atten_dst into theta, zero-pad, cast) ----
    w_aug = jnp.zeros((f_in, f_pad), jnp.float32)
    w_aug = w_aug.at[:, :f_out].set(w).at[:, f_out].set((w @ wdst)[:, 0])
    b_aug = jnp.zeros((1, f_pad), jnp.float32)
    b_aug = b_aug.at[:, :f_out].set(b).at[:, f_out].set((b @ wdst)[0, 0])
    ws_aug = jnp.zeros((1, f_pad), jnp.float32).at[:, :f_out].set(wsrc)
    x_p = jnp.zeros((n_pad, f_in), jnp.bfloat16).at[:N, :].set(x.astype(jnp.bfloat16))

    if adj.dtype == jnp.int8 and adj.shape == (n_pad, n_pad):
        adj_p = adj                              # already prepared (hoisted hot path)
    else:
        adj_p = prepare_adjacency(adj, n_pad)

    # ---- kernel 1: row-tiled projection ----
    y_bf, s_row, d_col = pl.pallas_call(
        functools.partial(_project_kernel, f_out),
        out_shape=(
            jax.ShapeDtypeStruct((n_pad, f_pad), jnp.bfloat16),
            jax.ShapeDtypeStruct((1, n_pad), jnp.float32),
            jax.ShapeDtypeStruct((n_pad, 1), jnp.float32),
        ),
        grid=(n_pad // tile_r,),
        in_specs=[
            pl.BlockSpec((tile_r, f_in), lambda i: (i, 0)),    # x row tile
            pl.BlockSpec((f_in, f_pad), lambda i: (0, 0)),     # W (grid-constant)
            pl.BlockSpec((1, f_pad), lambda i: (0, 0)),        # b
            pl.BlockSpec((1, f_pad), lambda i: (0, 0)),        # w_src
        ],
        out_specs=(
            pl.BlockSpec((tile_r, f_pad), lambda i: (i, 0)),
            pl.BlockSpec((1, tile_r), lambda i: (0, i)),
            pl.BlockSpec((tile_r, 1), lambda i: (i, 0)),
        ),
        compiler_params=pltpu.CompilerParams(
            dimension_semantics=("parallel",),
            vmem_limit_bytes=32 * 1024 * 1024),
    )(x_p, w_aug.astype(jnp.bfloat16), b_aug, ws_aug)

    # ---- kernel 2: dst-parallel x src-sequential online-softmax attention ----
    out_p = pl.pallas_call(
        functools.partial(_attend_kernel, edge_dtype),
        out_shape=jax.ShapeDtypeStruct((n_pad, f_pad), jnp.float32),
        grid=(n_pad // tile_m, n_pad // tile_k),
        in_specs=[
            pl.BlockSpec((1, tile_k), lambda i, k: (0, k)),        # s    (src tile)
            pl.BlockSpec((tile_m, 1), lambda i, k: (i, 0)),        # d    (dst tile)
            pl.BlockSpec((tile_k, f_pad), lambda i, k: (k, 0)),    # Y    (src tile, bf16)
            pl.BlockSpec((tile_m, tile_k), lambda i, k: (i, k)),   # adj  (int8 block)
        ],
        out_specs=pl.BlockSpec((tile_m, f_pad), lambda i, k: (i, 0)),
        scratch_shapes=[
            pltpu.VMEM((tile_m, 1), jnp.float32),      # running max
            pltpu.VMEM((tile_m, 1), jnp.float32),      # running sum
            pltpu.VMEM((tile_m, f_pad), jnp.float32),  # running aggregation
        ],
        compiler_params=pltpu.CompilerParams(
            dimension_semantics=("parallel", "arbitrary"),
            vmem_limit_bytes=32 * 1024 * 1024),
    )(s_row, d_col, y_bf, adj_p)

    return out_p[:N, :f_out]


def gat_ref(x, w, b, wsrc, wdst, adj):
    # pure-JAX f32 reference for correctness checking
    y = x @ w + b
    s = y @ wsrc.T                       # (N, 1)
    d = y @ wdst                         # (N, 1)
    scores = d + s.T                     # (N, N): [dst, src]
    e = jnp.where(scores > 0, scores, jnp.exp(jnp.minimum(scores, 0.0)) - 1.0)
    logits = jnp.where(adj > 0, e, -1e30)
    m = jnp.max(logits, axis=-1, keepdims=True)
    p = jnp.exp(logits - m) * adj
    denom = jnp.maximum(jnp.sum(p, axis=-1, keepdims=True), 1e-30)
    alpha = p / denom
    agg = alpha @ y
    return jnp.where(agg > 0, agg, jnp.exp(jnp.minimum(agg, 0.0)) - 1.0)


if __name__ == "__main__":
    key = jax.random.PRNGKey(0)
    N, F_in, F_out = 200, 32, 32          # N=200 exercises both the N and F padding paths
    k = jax.random.split(key, 6)

    x = jax.random.normal(k[0], (N, F_in), jnp.float32)

    # deterministic nn.Linear-style uniform init
    bt = 1.0 / (F_in ** 0.5)
    w = jax.random.uniform(k[1], (F_in, F_out), jnp.float32, -bt, bt)
    b = jax.random.uniform(k[2], (1, F_out), jnp.float32, -bt, bt)
    ba = 1.0 / (F_out ** 0.5)
    wsrc = jax.random.uniform(k[3], (1, F_out), jnp.float32, -ba, ba)
    wdst = jax.random.uniform(k[4], (F_out, 1), jnp.float32, -ba, ba)

    # random directed cascade graph: adj[dst, src] = 1 iff edge src->dst (density ~0.15)
    adj = (jax.random.uniform(k[5], (N, N)) < 0.15).astype(jnp.float32)

    # Hoist the O(N^2) adjacency pad + int8 cast out of the per-call hot path.
    tile_m, tile_k, n_pad = _plan_tiles(N)
    adj_i8 = jax.block_until_ready(prepare_adjacency(adj, n_pad))

    out = gat_conv(x, w, b, wsrc, wdst, adj_i8, tile_m=tile_m, tile_k=tile_k)
    out = jax.block_until_ready(out)

    ref = gat_ref(x, w, b, wsrc, wdst, adj)
    assert out.shape == (N, F_out)
    max_err = float(jnp.max(jnp.abs(out - ref)))
    # tolerance loosened vs. pure-f32: bf16 MXU operands, (on v6e/v7x) bf16 edge math,
    # and the approximate reciprocal in the deferred softmax normalization
    assert jnp.allclose(out, ref, rtol=5e-2, atol=5e-2), \
        f"mismatch vs reference (max |err|={max_err})"

    print("KERNEL_OK")
</pallas_src>

<mosaic_0001>
module attributes {stable_mosaic.version = 11 : i64} {
  func.func @_project_kernel(%arg0: i32, %arg1: memref<256x32xbf16, #tpu.memory_space<vmem>>, %arg2: memref<32x128xbf16, #tpu.memory_space<vmem>>, %arg3: memref<1x128xf32, #tpu.memory_space<vmem>>, %arg4: memref<1x128xf32, #tpu.memory_space<vmem>>, %arg5: memref<256x128xbf16, #tpu.memory_space<vmem>>, %arg6: memref<1x256xf32, #tpu.memory_space<vmem>>, %arg7: memref<256x1xf32, #tpu.memory_space<vmem>>) attributes {dimension_semantics = [#tpu.dimension_semantics<parallel>], iteration_bounds = array<i64: 1>, scalar_prefetch = 0 : i64, scratch_operands = 0 : i64, tpu.core_type = #tpu.core_type<tc>, window_params = [{transform_indices = @transform_0, window_bounds = array<i64: 256, 32>}, {pipeline_mode = #tpu.pipeline_mode<synchronous>, transform_indices = @transform_1, window_bounds = array<i64: 32, 128>}, {pipeline_mode = #tpu.pipeline_mode<synchronous>, transform_indices = @transform_2, window_bounds = array<i64: 1, 128>}, {pipeline_mode = #tpu.pipeline_mode<synchronous>, transform_indices = @transform_3, window_bounds = array<i64: 1, 128>}, {transform_indices = @transform_4, window_bounds = array<i64: 256, 128>}, {transform_indices = @transform_5, window_bounds = array<i64: 1, 256>}, {transform_indices = @transform_6, window_bounds = array<i64: 256, 1>}]} {
    %c0 = arith.constant 0 : index
    %c0_0 = arith.constant 0 : index
    %0 = vector.load %arg1[%c0, %c0_0] : memref<256x32xbf16, #tpu.memory_space<vmem>>, vector<256x32xbf16>
    %c0_1 = arith.constant 0 : index
    %c0_2 = arith.constant 0 : index
    %1 = vector.load %arg2[%c0_1, %c0_2] : memref<32x128xbf16, #tpu.memory_space<vmem>>, vector<32x128xbf16>
    %cst = arith.constant dense<0.000000e+00> : vector<256x128xf32>
    %2 = tpu.matmul %0, %1, %cst {dimension_numbers = #tpu.dot_dimension_numbers<[1], [0], [0], [1], [0, 0, 1, 1], [], []>} : vector<256x32xbf16>, vector<32x128xbf16>, vector<256x128xf32> -> vector<256x128xf32>
    %c0_3 = arith.constant 0 : index
    %c0_4 = arith.constant 0 : index
    %3 = vector.load %arg3[%c0_3, %c0_4] : memref<1x128xf32, #tpu.memory_space<vmem>>, vector<1x128xf32>
    %4 = vector.broadcast %3 : vector<1x128xf32> to vector<256x128xf32>
    %5 = arith.addf %2, %4 : vector<256x128xf32>
    %c0_5 = arith.constant 0 : index
    %c0_6 = arith.constant 0 : index
    %6 = vector.load %arg4[%c0_5, %c0_6] : memref<1x128xf32, #tpu.memory_space<vmem>>, vector<1x128xf32>
    %cst_7 = arith.constant dense<0.000000e+00> : vector<1x256xf32>
    %7 = tpu.matmul %6, %5, %cst_7 {dimension_numbers = #tpu.dot_dimension_numbers<[1], [1], [0], [0], [0, 0, 1, 0], [], []>} : vector<1x128xf32>, vector<256x128xf32>, vector<1x256xf32> -> vector<1x256xf32>
    %c0_8 = arith.constant 0 : index
    %c0_9 = arith.constant 0 : index
    %8 = vector.load %arg6[%c0_8, %c0_9] : memref<1x256xf32, #tpu.memory_space<vmem>>, vector<1x256xf32>
    tpu.vector_store %arg6[%c0_8, %c0_9], %7 {strides = array<i32>} : memref<1x256xf32, #tpu.memory_space<vmem>>, vector<1x256xf32>,
    %9 = vector.extract_strided_slice %5 {offsets = [0, 32], sizes = [256, 1], strides = [1, 1]} : vector<256x128xf32> to vector<256x1xf32>
    %c0_10 = arith.constant 0 : index
    %c0_11 = arith.constant 0 : index
    %10 = vector.load %arg7[%c0_10, %c0_11] : memref<256x1xf32, #tpu.memory_space<vmem>>, vector<256x1xf32>
    tpu.vector_store %arg7[%c0_10, %c0_11], %9 {strides = array<i32>} : memref<256x1xf32, #tpu.memory_space<vmem>>, vector<256x1xf32>,
    %11 = arith.truncf %5 : vector<256x128xf32> to vector<256x128xbf16>
    %c0_12 = arith.constant 0 : index
    %c0_13 = arith.constant 0 : index
    %12 = vector.load %arg5[%c0_12, %c0_13] : memref<256x128xbf16, #tpu.memory_space<vmem>>, vector<256x128xbf16>
    tpu.vector_store %arg5[%c0_12, %c0_13], %11 {strides = array<i32>} : memref<256x128xbf16, #tpu.memory_space<vmem>>, vector<256x128xbf16>,
    return
  }
  func.func @transform_0(%arg0: i32) -> (i32, i32) {
    %c0_i32 = arith.constant 0 : i32
    %c0_i32_0 = arith.constant 0 : i32
    return %arg0, %c0_i32 : i32, i32
  }
  func.func @transform_1(%arg0: i32) -> (i32, i32) {
    %c0_i32 = arith.constant 0 : i32
    %c0_i32_0 = arith.constant 0 : i32
    %c0_i32_1 = arith.constant 0 : i32
    return %c0_i32, %c0_i32_0 : i32, i32
  }
  func.func @transform_2(%arg0: i32) -> (i32, i32) {
    %c0_i32 = arith.constant 0 : i32
    %c0_i32_0 = arith.constant 0 : i32
    %c0_i32_1 = arith.constant 0 : i32
    return %c0_i32, %c0_i32_0 : i32, i32
  }
  func.func @transform_3(%arg0: i32) -> (i32, i32) {
    %c0_i32 = arith.constant 0 : i32
    %c0_i32_0 = arith.constant 0 : i32
    %c0_i32_1 = arith.constant 0 : i32
    return %c0_i32, %c0_i32_0 : i32, i32
  }
  func.func @transform_4(%arg0: i32) -> (i32, i32) {
    %c0_i32 = arith.constant 0 : i32
    %c0_i32_0 = arith.constant 0 : i32
    return %arg0, %c0_i32 : i32, i32
  }
  func.func @transform_5(%arg0: i32) -> (i32, i32) {
    %c0_i32 = arith.constant 0 : i32
    %c0_i32_0 = arith.constant 0 : i32
    return %c0_i32, %arg0 : i32, i32
  }
  func.func @transform_6(%arg0: i32) -> (i32, i32) {
    %c0_i32 = arith.constant 0 : i32
    %c0_i32_0 = arith.constant 0 : i32
    return %arg0, %c0_i32 : i32, i32
  }
}

</mosaic_0001>

<bundles_post_ra>
// kernel: tpu_custom_call.1
= control target key start
LH: loop header
LB: loop body
LE: loop exit
PB: predicated region body
PF: predicated region fallthrough
CT: control target
= control target key end

     0   :  { %12 = vsyncpa [#allocation3], 0  ;;  %vm158_vm0 = vcmask 261120   ;;  %s1594_s0 = inlined_call_operand.vmem [shape: bf16[256,32], index: 0, kind: input, shape index: {}]   ;;  %s1595_s1 = inlined_call_operand.vmem [shape: bf16[32,128], index: 1, kind: input, shape index: {}]   ;;  %s1596_s2 = inlined_call_operand.vmem [shape: f32[1,128], index: 2, kind: input, shape index: {}]   ;;  %s1597_s3 = inlined_call_operand.vmem [shape: f32[1,128], index: 3, kind: input, shape index: {}]   ;;  %s1598_s4 = inlined_call_operand.hbm [shape: bf16[256,128], index: 4, kind: output, shape index: {0}]   ;;  %s1599_s5 = inlined_call_operand.hbm [shape: f32[1,256], index: 5, kind: output, shape index: {1}]   ;;  %s1600_s6 = inlined_call_operand.vmem [shape: f32[256,1], index: 6, kind: output, shape index: {2}]  }
   0x1   :  { %v1106_v0 = vld [vmem:[%s1595_s1 + $0x8] sm:$0xff]   ;;  %v1107_v1 = vld [vmem:[%s1595_s1] sm:$0xff]   ;;  %v1110_v4 = vld [vmem:[%s1594_s0 + $0x10] sm:$0xff]  }
   0x2   :  { %1064 = vmatprep.subr.bf16.mxu0 %v1106_v0  ;;  %v1108_v2 = vld [vmem:[%s1594_s0] sm:$0xff]   ;;  %v1109_v3 = vld [vmem:[%s1594_s0 + $0x8] sm:$0xff]   ;;  %v1111_v5 = vld [vmem:[%s1594_s0 + $0x18] sm:$0xff]  }
   0x3   :  { %1065 = vmatpush3.bf16.msra.mxu0 %v1106_v0  ;;  %1068 = vmatprep.mubr.msk.bf16.mxu0 %vm158_vm0, %v1108_v2  ;;  %v1112_v6 = vld [vmem:[%s1594_s0 + $0x20] sm:$0xff]  }
   0x4   :  { %1066 = vmatprep.subr.bf16.mxu0 %v1107_v1 }
   0x7   :  { %1067 = vmatpush3.bf16.msra.mxu0 %v1107_v1 }
   0xa   :  { %1069 = vmatmul.mubr.msk.bf16.vlgmr.msra.gmra.mxu0 %vm158_vm0, %v1109_v3 }
   0xb   :  { %1072 = vmatprep.mubr.msk.bf16.mxu0 %vm158_vm0, %v1110_v4 }
  0x12   :  { %1073 = vmatmul.mubr.msk.bf16.gmra.mxu0 %vm158_vm0, %v1111_v5 }
  0x13   :  { %13 = vsyncpa [#allocation5], 0  ;;  %1076 = vmatprep.mubr.msk.bf16.mxu0 %vm158_vm0, %v1112_v6  ;;  %v1113_v7 = vld [vmem:[%s1594_s0 + $0x28] sm:$0xff]   ;;  %v1114_v8 = vld [vmem:[%s1594_s0 + $0x30] sm:$0xff]   ;;  %vm591_vm1 = vcmask 7168   ;;  %s1169_s17 = smov [#allocation2]  }
  0x14   :  { %v1115_v9 = vld [vmem:[%s1594_s0 + $0x38] sm:$0xff]   ;;  %v1116_v10 = vld [vmem:[%s1594_s0 + $0x40] sm:$0xff]   ;;  %v1117_v11 = vld [vmem:[%s1594_s0 + $0x48] sm:$0xff]   ;;  %s789_s18 = sshll.u32 %s1169_s17, 4  ;;  %s790_s18 = int_to_ptr.vmem [resolvable:$true] %s789_s18 }
  0x15   :  { %v1118_v12 = vld [vmem:[%s1594_s0 + $0x50] sm:$0xff]   ;;  %v1119_v13 = vld [vmem:[%s1594_s0 + $0x58] sm:$0xff]   ;;  %v1120_v14 = vld [vmem:[%s1594_s0 + $0x60] sm:$0xff]   ;;  %s1124_s19 = scalar_lea.vmem %s790_s18, 2048  ;;  %p1129_p1 = scmp.lt.s32.totalorder %s790_s18, %s790_s18 }
  0x16   :  { %v1121_v15 = vld [vmem:[%s1594_s0 + $0x68] sm:$0xff]   ;;  %v1122_v16 = vld [vmem:[%s1594_s0 + $0x70] sm:$0xff]   ;;  %v1123_v17 = vld [vmem:[%s1594_s0 + $0x78] sm:$0xff]   ;;  %s1168_s0 = smov 96   ;;  %p1125_p0 = scmp.ne.s32.totalorder %s790_s18, %s1124_s19 }
  0x17   :  { %v1282_v18 = vld [vmem:[%s1597_s3] sm:$0x1]  ;;  %p1130_p2 = scmp.lt.s32.totalorder %s1124_s19, %s1124_s19 }
  0x18   :  { %1062 = vmatprep.mubr.f32.mxu1 %v1282_v18  ;;  %v1288_v19 = vld [vmem:[%s1596_s2] ss:$0 sm:$0xff] }
  0x19   :  { %p1131_p3 = por %p1130_p2, %p1129_p1 }
  0x1a   :  { %1077 = vmatmul.mubr.msk.bf16.gmra.mxu0 %vm158_vm0, %v1113_v7 }
  0x1b   :  { %1080 = vmatprep.mubr.msk.bf16.mxu0 %vm158_vm0, %v1114_v8  ;;  %p1132_p4 = pnand %p1131_p3, %p1125_p0 }
  0x22   :  { %1081 = vmatmul.mubr.msk.bf16.gmra.mxu0 %vm158_vm0, %v1115_v9 }
  0x23   :  { %1084 = vmatprep.mubr.msk.bf16.mxu0 %vm158_vm0, %v1116_v10 }
  0x2a   :  { %1085 = vmatmul.mubr.msk.bf16.gmra.mxu0 %vm158_vm0, %v1117_v11 }
  0x2b   :  { %1088 = vmatprep.mubr.msk.bf16.mxu0 %vm158_vm0, %v1118_v12 }
  0x32   :  { %1089 = vmatmul.mubr.msk.bf16.gmra.mxu0 %vm158_vm0, %v1119_v13 }
  0x33   :  { %1092 = vmatprep.mubr.msk.bf16.mxu0 %vm158_vm0, %v1120_v14 }
  0x3a   :  { %1093 = vmatmul.mubr.msk.bf16.gmra.mxu0 %vm158_vm0, %v1121_v15 }
  0x3b   :  { %1096 = vmatprep.mubr.msk.bf16.mxu0 %vm158_vm0, %v1122_v16 }
  0x42   :  { %1097 = vmatmul.mubr.msk.bf16.gmra.mxu0 %vm158_vm0, %v1123_v17 }
  0xca   :  { %v1070_v20 = vpop.f32.mrf.mxu0 }
  0xcb   :  { %v1291_v21 = vadd.f32 %v1070_v20, %v1288_v19 }
  0xcc   :  { %v241_v22 = vpop.f32.mrf.mxu0 }
  0xcd   :  { %v1294_v23 = vadd.f32 %v1288_v19, %v241_v22  ;;  %499 = vrot.lane.b32.xlu1 %v1291_v21, %s1168_s0 }
  0xce   :  { %v1071_v24 = vpop.f32.mrf.mxu0 }
  0xcf   :  { %v1299_v25 = vadd.f32 %v1071_v24, %v1288_v19  ;;  %495 = vrot.lane.b32.xlu0 %v1294_v23, %s1168_s0 }
  0xd0   :  { %v244_v26 = vpop.f32.mrf.mxu0 }
  0xd1   :  { %v925_v27 = vpack.c.bf16 %v1299_v25, %v1291_v21  ;;  %v1306_v28 = vadd.f32 %v1288_v19, %v244_v26  ;;  %501 = vrot.lane.b32.xlu1 %v1299_v25, %s1168_s0 }
  0xd2   :  { %v1074_v29 = vpop.f32.mrf.mxu0 }
  0xd3   :  { %997 = vst [vmem:[#allocation2 + $0x8] sm:$0xff] %v925_v27   ;;  %v920_v30 = vpack.c.bf16 %v1306_v28, %v1294_v23  ;;  %497 = vrot.lane.b32.xlu0 %v1306_v28, %s1168_s0  ;;  %v1315_v32 = vadd.f32 %v1074_v29, %v1288_v19 }
  0xd4   :  { %v257_v31 = vpop.f32.mrf.mxu0 }
  0xd5   :  { %921 = vst [vmem:[#allocation2] sm:$0xff] %v920_v30   ;;  %v1323_v36 = vadd.f32 %v1288_v19, %v257_v31 }
  0xd6   :  { %v1075_v33 = vpop.f32.mrf.mxu0 }
  0xd7   :  { %v1318_v34 = vadd.f32 %v1075_v33, %v1288_v19  ;;  %507 = vrot.lane.b32.xlu0 %v1315_v32, %s1168_s0 }
  0xd8   :  { %v260_v35 = vpop.f32.mrf.mxu0 }
  0xd9   :  { %v935_v37 = vpack.c.bf16 %v1318_v34, %v1315_v32  ;;  %v1328_v38 = vadd.f32 %v1288_v19, %v260_v35  ;;  %509 = vrot.lane.b32.xlu1 %v1318_v34, %s1168_s0 }
  0xda   :  { %v1078_v39 = vpop.f32.mrf.mxu0 }
  0xdb   :  { %999 = vst [vmem:[#allocation2 + $0x18] sm:$0xff] %v935_v37   ;;  %v930_v40 = vpack.c.bf16 %v1328_v38, %v1323_v36  ;;  %503 = vrot.lane.b32.xlu0 %v1323_v36, %s1168_s0  ;;  %v1337_v42 = vadd.f32 %v1078_v39, %v1288_v19 }
  0xdc   :  { %v273_v41 = vpop.f32.mrf.mxu0 }
  0xdd   :  { %998 = vst [vmem:[#allocation2 + $0x10] sm:$0xff] %v930_v40   ;;  %505 = vrot.lane.b32.xlu1 %v1328_v38, %s1168_s0  ;;  %v1347_v46 = vadd.f32 %v1288_v19, %v273_v41 }
  0xde   :  { %v1079_v43 = vpop.f32.mrf.mxu0 }
  0xdf   :  { %v1342_v44 = vadd.f32 %v1079_v43, %v1288_v19  ;;  %515 = vrot.lane.b32.xlu0 %v1337_v42, %s1168_s0 }
  0xe0   :  { %v276_v45 = vpop.f32.mrf.mxu0 }
  0xe1   :  { %v945_v47 = vpack.c.bf16 %v1342_v44, %v1337_v42  ;;  %v1352_v48 = vadd.f32 %v1288_v19, %v276_v45  ;;  %517 = vrot.lane.b32.xlu1 %v1342_v44, %s1168_s0 }
  0xe2   :  { %v1082_v49 = vpop.f32.mrf.mxu0 }
  0xe3   :  { %1001 = vst [vmem:[#allocation2 + $0x28] sm:$0xff] %v945_v47   ;;  %v940_v50 = vpack.c.bf16 %v1352_v48, %v1347_v46  ;;  %511 = vrot.lane.b32.xlu0 %v1347_v46, %s1168_s0  ;;  %v1361_v52 = vadd.f32 %v1082_v49, %v1288_v19 }
  0xe4   :  { %v289_v51 = vpop.f32.mrf.mxu0 }
  0xe5   :  { %1000 = vst [vmem:[#allocation2 + $0x20] sm:$0xff] %v940_v50   ;;  %513 = vrot.lane.b32.xlu1 %v1352_v48, %s1168_s0  ;;  %v1371_v56 = vadd.f32 %v1288_v19, %v289_v51 }
  0xe6   :  { %v1083_v53 = vpop.f32.mrf.mxu0 }
  0xe7   :  { %v1366_v54 = vadd.f32 %v1083_v53, %v1288_v19  ;;  %523 = vrot.lane.b32.xlu0 %v1361_v52, %s1168_s0 }
  0xe8   :  { %v292_v55 = vpop.f32.mrf.mxu0 }
  0xe9   :  { %v955_v57 = vpack.c.bf16 %v1366_v54, %v1361_v52  ;;  %v1376_v58 = vadd.f32 %v1288_v19, %v292_v55  ;;  %525 = vrot.lane.b32.xlu1 %v1366_v54, %s1168_s0 }
  0xea   :  { %v1086_v59 = vpop.f32.mrf.mxu0 }
  0xeb   :  { %1003 = vst [vmem:[#allocation2 + $0x38] sm:$0xff] %v955_v57   ;;  %v950_v60 = vpack.c.bf16 %v1376_v58, %v1371_v56  ;;  %519 = vrot.lane.b32.xlu0 %v1371_v56, %s1168_s0  ;;  %v1385_v62 = vadd.f32 %v1086_v59, %v1288_v19 }
  0xec   :  { %v305_v61 = vpop.f32.mrf.mxu0 }
  0xed   :  { %1002 = vst [vmem:[#allocation2 + $0x30] sm:$0xff] %v950_v60   ;;  %521 = vrot.lane.b32.xlu1 %v1376_v58, %s1168_s0  ;;  %v1395_v2 = vadd.f32 %v1288_v19, %v305_v61 }
  0xee   :  { %v1087_v63 = vpop.f32.mrf.mxu0 }
  0xef   :  { %v1390_v0 = vadd.f32 %v1087_v63, %v1288_v19  ;;  %531 = vrot.lane.b32.xlu0 %v1385_v62, %s1168_s0 }
  0xf0   :  { %v308_v1 = vpop.f32.mrf.mxu0 }
  0xf1   :  { %v965_v3 = vpack.c.bf16 %v1390_v0, %v1385_v62  ;;  %v1400_v4 = vadd.f32 %v1288_v19, %v308_v1  ;;  %533 = vrot.lane.b32.xlu1 %v1390_v0, %s1168_s0 }
  0xf2   :  { %v1090_v5 = vpop.f32.mrf.mxu0 }
  0xf3   :  { %1005 = vst [vmem:[#allocation2 + $0x48] sm:$0xff] %v965_v3   ;;  %v960_v6 = vpack.c.bf16 %v1400_v4, %v1395_v2  ;;  %527 = vrot.lane.b32.xlu0 %v1395_v2, %s1168_s0  ;;  %v1409_v8 = vadd.f32 %v1090_v5, %v1288_v19 }
  0xf4   :  { %v321_v7 = vpop.f32.mrf.mxu0 }
  0xf5   :  { %1004 = vst [vmem:[#allocation2 + $0x40] sm:$0xff] %v960_v6   ;;  %529 = vrot.lane.b32.xlu1 %v1400_v4, %s1168_s0  ;;  %v322_v12 = vadd.f32 %v1288_v19, %v321_v7 }
  0xf6   :  { %v1091_v9 = vpop.f32.mrf.mxu0 }
  0xf7   :  { %v333_v10 = vadd.f32 %v1091_v9, %v1288_v19  ;;  %539 = vrot.lane.b32.xlu0 %v1409_v8, %s1168_s0 }
  0xf8   :  { %v324_v11 = vpop.f32.mrf.mxu0 }
  0xf9   :  { %v975_v13 = vpack.c.bf16 %v333_v10, %v1409_v8  ;;  %v325_v14 = vadd.f32 %v1288_v19, %v324_v11  ;;  %541 = vrot.lane.b32.xlu1 %v333_v10, %s1168_s0 }
  0xfa   :  { %v1094_v15 = vpop.f32.mrf.mxu0 }
  0xfb   :  { %1007 = vst [vmem:[#allocation2 + $0x58] sm:$0xff] %v975_v13   ;;  %v970_v16 = vpack.c.bf16 %v325_v14, %v322_v12  ;;  %535 = vrot.lane.b32.xlu0 %v322_v12, %s1168_s0  ;;  %v346_v20 = vadd.f32 %v1094_v15, %v1288_v19 }
  0xfc   :  { %v337_v17 = vpop.f32.mrf.mxu0 }
  0xfd   :  { %1006 = vst [vmem:[#allocation2 + $0x50] sm:$0xff] %v970_v16   ;;  %537 = vrot.lane.b32.xlu1 %v325_v14, %s1168_s0  ;;  %v338_v27 = vadd.f32 %v1288_v19, %v337_v17 }
  0xfe   :  { %v1095_v22 = vpop.f32.mrf.mxu0 }
  0xff   :  { %v349_v24 = vadd.f32 %v1095_v22, %v1288_v19  ;;  %547 = vrot.lane.b32.xlu0 %v346_v20, %s1168_s0 }
 0x100   :  { %v340_v26 = vpop.f32.mrf.mxu0 }
 0x101   :  { %v985_v29 = vpack.c.bf16 %v349_v24, %v346_v20  ;;  %v341_v30 = vadd.f32 %v1288_v19, %v340_v26  ;;  %549 = vrot.lane.b32.xlu1 %v349_v24, %s1168_s0 }
 0x102   :  { %v1098_v31 = vpop.f32.mrf.mxu0 }
 0x103   :  { %1009 = vst [vmem:[#allocation2 + $0x68] sm:$0xff] %v985_v29   ;;  %v980_v33 = vpack.c.bf16 %v341_v30, %v338_v27  ;;  %543 = vrot.lane.b32.xlu0 %v338_v27, %s1168_s0  ;;  %v362_v40 = vadd.f32 %v1098_v31, %v1288_v19 }
 0x104   :  { %v353_v35 = vpop.f32.mrf.mxu0 }
 0x105   :  { %1008 = vst [vmem:[#allocation2 + $0x60] sm:$0xff] %v980_v33   ;;  %v354_v37 = vadd.f32 %v1288_v19, %v353_v35  ;;  %545 = vrot.lane.b32.xlu1 %v341_v30, %s1168_s0 }
 0x106   :  { %v1099_v39 = vpop.f32.mrf.mxu0 }
 0x107   :  { %v365_v41 = vadd.f32 %v1099_v39, %v1288_v19  ;;  %551 = vrot.lane.b32.xlu0 %v354_v37, %s1168_s0 }
 0x108   :  { %v356_v43 = vpop.f32.mrf.mxu0 }
 0x109   :  { %v995_v45 = vpack.c.bf16 %v365_v41, %v362_v40  ;;  %v357_v47 = vadd.f32 %v1288_v19, %v356_v43  ;;  %1030 = vmatprep.subr.mxu1 %v365_v41 }
 0x10a   :  { %1031 = vmatpush3.xpose.msra.mxu1 %v1366_v54 }
 0x10b   :  { %1011 = vst [vmem:[#allocation2 + $0x78] sm:$0xff] %v995_v45   ;;  %v990_v49 = vpack.c.bf16 %v357_v47, %v354_v37  ;;  %1032 = vmatprep.subr.mxu1 %v362_v40  ;;  %553 = vrot.lane.b32.xlu1 %v357_v47, %s1168_s0 }
 0x10c   :  { %555 = vrot.lane.b32.xlu0 %v362_v40, %s1168_s0 }
 0x10d   :  { %1010 = vst [vmem:[#allocation2 + $0x70] sm:$0xff] %v990_v49  }
 0x10e   :  { %1033 = vmatpush3.xpose.msra.mxu1 %v1361_v52 }
 0x10f   :  { %1034 = vmatprep.subr.mxu1 %v357_v47  ;;  %557 = vrot.lane.b32.xlu1 %v365_v41, %s1168_s0 }
 0x112   :  { %1035 = vmatpush3.xpose.msra.mxu1 %v1376_v58 }
 0x113   :  { %1036 = vmatprep.subr.mxu1 %v354_v37 }
 0x116   :  { %1037 = vmatpush3.xpose.msra.mxu1 %v1371_v56 }
 0x117   :  { %1038 = vmatprep.subr.mxu1 %v349_v24 }
 0x11a   :  { %1039 = vmatpush3.xpose.msra.mxu1 %v1342_v44 }
 0x11b   :  { %1040 = vmatprep.subr.mxu1 %v346_v20 }
 0x11e   :  { %1041 = vmatpush3.xpose.msra.mxu1 %v1337_v42 }
 0x11f   :  { %1042 = vmatprep.subr.mxu1 %v341_v30 }
 0x122   :  { %1043 = vmatpush3.xpose.msra.mxu1 %v1352_v48 }
 0x123   :  { %1044 = vmatprep.subr.mxu1 %v338_v27 }
 0x126   :  { %1045 = vmatpush3.xpose.msra.mxu1 %v1347_v46 }
 0x127   :  { %1046 = vmatprep.subr.mxu1 %v333_v10 }
 0x12a   :  { %1047 = vmatpush3.xpose.msra.mxu1 %v1318_v34 }
 0x12b   :  { %1048 = vmatprep.subr.mxu1 %v1409_v8 }
 0x12e   :  { %1049 = vmatpush3.xpose.msra.mxu1 %v1315_v32 }
 0x12f   :  { %1050 = vmatprep.subr.mxu1 %v325_v14 }
 0x132   :  { %1051 = vmatpush3.xpose.msra.mxu1 %v1328_v38 }
 0x133   :  { %1052 = vmatprep.subr.mxu1 %v322_v12 }
 0x136   :  { %1053 = vmatpush3.xpose.msra.mxu1 %v1323_v36 }
 0x137   :  { %1054 = vmatprep.subr.mxu1 %v1390_v0 }
 0x13a   :  { %1055 = vmatpush3.xpose.msra.mxu1 %v1299_v25 }
 0x13b   :  { %1056 = vmatprep.subr.mxu1 %v1385_v62 }
 0x13e   :  { %1057 = vmatpush3.xpose.msra.mxu1 %v1291_v21 }
 0x13f   :  { %v500_v19 = vpop.permute.xlu1 %499  ;;  %1058 = vmatprep.subr.mxu1 %v1400_v4 }
 0x140   :  { %594 = vst.msk [vmem:[%s1600_s6 + $0x10] sm:$0xff] %vm591_vm1, %v500_v19 }
 0x141   :  { %v496_v32 = vpop.permute.xlu0 %495 }
 0x142   :  { %592 = vst.msk [vmem:[%s1600_s6] sm:$0xff] %vm591_vm1, %v496_v32  ;;  %1059 = vmatpush3.xpose.msra.mxu1 %v1306_v28 }
 0x143   :  { %v502_v25 = vpop.permute.xlu1 %501  ;;  %1060 = vmatprep.subr.mxu1 %v1395_v2 }
 0x144   :  { %595 = vst.msk [vmem:[%s1600_s6 + $0x18] sm:$0xff] %vm591_vm1, %v502_v25 }
 0x145   :  { %v498_v21 = vpop.permute.xlu0 %497 }
 0x146   :  { %593 = vst.msk [vmem:[%s1600_s6 + $0x8] sm:$0xff] %vm591_vm1, %v498_v21  ;;  %1061 = vmatpush3.xpose.msra.mxu1 %v1294_v23 }
 0x149   :  { %v508_v34 = vpop.permute.xlu0 %507  ;;  %1063 = vmatmul.mubr.f32.vlgmr.msra.gmra.mxu1 %v1282_v18 }
 0x14a   :  { %598 = vst.msk [vmem:[%s1600_s6 + $0x30] sm:$0xff] %vm591_vm1, %v508_v34 }
 0x14b   :  { %v510_v28 = vpop.permute.xlu1 %509 }
 0x14c   :  { %599 = vst.msk [vmem:[%s1600_s6 + $0x38] sm:$0xff] %vm591_vm1, %v510_v28 }
 0x14d   :  { %v504_v36 = vpop.permute.xlu0 %503 }
 0x14e   :  { %596 = vst.msk [vmem:[%s1600_s6 + $0x20] sm:$0xff] %vm591_vm1, %v504_v36 }
 0x14f   :  { %v506_v23 = vpop.permute.xlu1 %505 }
 0x150   :  { %597 = vst.msk [vmem:[%s1600_s6 + $0x28] sm:$0xff] %vm591_vm1, %v506_v23 }
 0x151   :  { %v516_v18 = vpop.permute.xlu0 %515 }
 0x152   :  { %602 = vst.msk [vmem:[%s1600_s6 + $0x50] sm:$0xff] %vm591_vm1, %v516_v18 }
 0x153   :  { %v518_v38 = vpop.permute.xlu1 %517 }
 0x154   :  { %603 = vst.msk [vmem:[%s1600_s6 + $0x58] sm:$0xff] %vm591_vm1, %v518_v38 }
 0x155   :  { %v512_v42 = vpop.permute.xlu0 %511 }
 0x156   :  { %600 = vst.msk [vmem:[%s1600_s6 + $0x40] sm:$0xff] %vm591_vm1, %v512_v42 }
 0x157   :  { %v514_v44 = vpop.permute.xlu1 %513 }
 0x158   :  { %601 = vst.msk [vmem:[%s1600_s6 + $0x48] sm:$0xff] %vm591_vm1, %v514_v44 }
 0x159   :  { %v524_v46 = vpop.permute.xlu0 %523 }
 0x15a   :  { %606 = vst.msk [vmem:[%s1600_s6 + $0x70] sm:$0xff] %vm591_vm1, %v524_v46 }
 0x15b   :  { %v526_v48 = vpop.permute.xlu1 %525 }
 0x15c   :  { %607 = vst.msk [vmem:[%s1600_s6 + $0x78] sm:$0xff] %vm591_vm1, %v526_v48 }
 0x15d   :  { %v520_v50 = vpop.permute.xlu0 %519 }
 0x15e   :  { %604 = vst.msk [vmem:[%s1600_s6 + $0x60] sm:$0xff] %vm591_vm1, %v520_v50 }
 0x15f   :  { %v522_v51 = vpop.permute.xlu1 %521 }
 0x160   :  { %605 = vst.msk [vmem:[%s1600_s6 + $0x68] sm:$0xff] %vm591_vm1, %v522_v51 }
 0x161   :  { %v532_v52 = vpop.permute.xlu0 %531 }
 0x162   :  { %610 = vst.msk [vmem:[%s1600_s6 + $0x90] sm:$0xff] %vm591_vm1, %v532_v52 }
 0x163   :  { %v534_v53 = vpop.permute.xlu1 %533 }
 0x164   :  { %611 = vst.msk [vmem:[%s1600_s6 + $0x98] sm:$0xff] %vm591_vm1, %v534_v53 }
 0x165   :  { %v528_v54 = vpop.permute.xlu0 %527 }
 0x166   :  { %608 = vst.msk [vmem:[%s1600_s6 + $0x80] sm:$0xff] %vm591_vm1, %v528_v54 }
 0x167   :  { %v530_v55 = vpop.permute.xlu1 %529 }
 0x168   :  { %609 = vst.msk [vmem:[%s1600_s6 + $0x88] sm:$0xff] %vm591_vm1, %v530_v55 }
 0x169   :  { %v540_v56 = vpop.permute.xlu0 %539 }
 0x16a   :  { %614 = vst.msk [vmem:[%s1600_s6 + $0xb0] sm:$0xff] %vm591_vm1, %v540_v56 }
 0x16b   :  { %v542_v57 = vpop.permute.xlu1 %541 }
 0x16c   :  { %615 = vst.msk [vmem:[%s1600_s6 + $0xb8] sm:$0xff] %vm591_vm1, %v542_v57 }
 0x16d   :  { %v536_v58 = vpop.permute.xlu0 %535 }
 0x16e   :  { %612 = vst.msk [vmem:[%s1600_s6 + $0xa0] sm:$0xff] %vm591_vm1, %v536_v58 }
 0x16f   :  { %v538_v59 = vpop.permute.xlu1 %537 }
 0x170   :  { %613 = vst.msk [vmem:[%s1600_s6 + $0xa8] sm:$0xff] %vm591_vm1, %v538_v59 }
 0x171   :  { %v548_v60 = vpop.permute.xlu0 %547 }
 0x172   :  { %618 = vst.msk [vmem:[%s1600_s6 + $0xd0] sm:$0xff] %vm591_vm1, %v548_v60 }
 0x173   :  { %v550_v61 = vpop.permute.xlu1 %549 }
 0x174   :  { %619 = vst.msk [vmem:[%s1600_s6 + $0xd8] sm:$0xff] %vm591_vm1, %v550_v61 }
 0x175   :  { %v544_v62 = vpop.permute.xlu0 %543 }
 0x176   :  { %616 = vst.msk [vmem:[%s1600_s6 + $0xc0] sm:$0xff] %vm591_vm1, %v544_v62 }
 0x177   :  { %v546_v63 = vpop.permute.xlu1 %545 }
 0x178   :  { %617 = vst.msk [vmem:[%s1600_s6 + $0xc8] sm:$0xff] %vm591_vm1, %v546_v63 }
 0x179   :  { %v552_v0 = vpop.permute.xlu0 %551 }
 0x17a   :  { %620 = vst.msk [vmem:[%s1600_s6 + $0xe0] sm:$0xff] %vm591_vm1, %v552_v0 }
 0x17d   :  { %v554_v1 = vpop.permute.xlu1 %553 }
 0x17e   :  { %621 = vst.msk [vmem:[%s1600_s6 + $0xe8] sm:$0xff] %vm591_vm1, %v554_v1  ;;  %v556_v2 = vpop.permute.xlu0 %555 }
 0x17f   :  { %622 = vst.msk [vmem:[%s1600_s6 + $0xf0] sm:$0xff] %vm591_vm1, %v556_v2 }
 0x181   :  { %v558_v3 = vpop.permute.xlu1 %557 }
 0x182   :  { %623 = vst.msk [vmem:[%s1600_s6 + $0xf8] sm:$0xff] %vm591_vm1, %v558_v3 }
 0x183   :  { %1135 = shalt.err (!%p1132_p4)
}
 0x184   :  { %s1170_s20 = smov 64   ;;  %s1171_s21 = smov 4   ;;  %v1172_v4 = vmov 1966171168   ;;  %v446_v6 = vlaneseq }
 0x185   :  { %795 = dma.vmem_to_hbm [thread:$0]  %s790_s18, 2048, %s1598_s4, [#allocation3], %s1170_s20, %s1170_s20, %s1171_s21   ;;  %v444_v5 = vunpack.c.l.s4 %v1172_v4 }
 0x186   :  { %v447_v8 = vshrl.u32 %v446_v6, 7  ;;  %s1173_s6 = smov [#allocation4]   ;;  %vm460_vm2 = vcmp.lt.s32.totalorder %v446_v6, 256 }
 0x187   :  { %v445_v7 = vunpack.c.0.s8 %v444_v5  ;;  %s802_s24 = sshll.u32 %s1173_s6, 4  ;;  %s803_s24 = int_to_ptr.vmem [resolvable:$true] %s802_s24 }
 0x188   :  { %s1144_s25 = scalar_lea.vmem %s803_s24, 32  ;;  %p1149_p6 = scmp.lt.s32.totalorder %s803_s24, %s803_s24 }
 0x189   :  { %v448_v10 = vsub.s32 %v445_v7, %v447_v8  ;;  %p1145_p5 = scmp.ne.s32.totalorder %s803_s24, %s1144_s25  ;;  %p1150_p7 = scmp.lt.s32.totalorder %s1144_s25, %s1144_s25 }
 0x18b   :  { %p1151_p8 = por %p1150_p7, %p1149_p6 }
 0x18d   :  { %p1152_p9 = pnand %p1151_p8, %p1145_p5 }
 0x209   :  { %v435_v9 = vpop.f32.mrf.mxu1 }
 0x20b   :  { %v437_v11 = vpop.f32.mrf.mxu1 }
 0x20c   :  { %v442_v12 = vcombine.low %v435_v9, %v437_v11 }
 0x20e   :  { %v449_v13 = vrot.slane %v442_v12, %v448_v10 }
 0x210   :  { %v456_v14 = vrot.slane %v449_v13, %v448_v10 }
 0x212   :  { %462 = vst.msk [vmem:[#allocation4] sm:$0x3] %vm460_vm2, %v456_v14 }
 0x213   :  { %1155 = shalt.err (!%p1152_p9)
}
 0x214   :  { %805 = dma.vmem_to_hbm [thread:$0]  %s803_s24, 32, %s1599_s5, [#allocation5]  }
 0x215   :  { %1164 = dma.done.wait [#allocation3], 2048  }
 0x216   :  { %1165 = vsyncadd [#allocation3], 4294965248 }
 0x217   :  { %1166 = dma.done.wait [#allocation5], 32  }
 0x218   :  { %1167 = vsyncadd [#allocation5], 4294967264 }
 0x219   :  { %816 = vsyncpa [#allocation3], 1 }
 0x21a   :  { %817 = vsyncpa [#allocation5], 1 }

</bundles_post_ra>
